<compile_context>
chip_gen: v7x
topology: tpu7x:2x2x1
jax: 0.10.0
libtpu: 0.0.40
codegen_flags: <defaults>
</compile_context>

<pallas_src>
import functools

import jax
import jax.numpy as jnp
from jax.experimental import pallas as pl
from jax.experimental.pallas import tpu as pltpu

ALPHA = 0.25
GAMMA = 2.0
LANE = 128
SUBLANE = 8
ROW_BLOCK = SUBLANE * LANE      # 1024-element granule handled by the kernel
MAX_TILE_ROWS = 1024            # (1024, 128) f32 block = 512 KiB per input per buffer


def _cdiv(a, b):
    return -(-a // b)


def _modulated_bce(p, t, hard):
    """(1 - pt)**gamma * bce per element (alpha and the mean are applied by caller)."""
    if hard:
        # Exact for {0,1} targets: pt = p if t == 1 else (1 - p).
        # One log per element instead of two logs + one exp (EUP is the
        # saturating VLIW slot on v6e/v7x).  Differs from PyTorch only in the
        # clamp region p or 1-p < e^-100.
        pt = t * p + (1.0 - t) * (1.0 - p)
        bce = -jnp.maximum(jnp.log(pt), -100.0)     # PyTorch BCE clamps log at -100
    else:
        # Exact PyTorch semantics for arbitrary (soft) targets.
        log_p = jnp.maximum(jnp.log(p), -100.0)
        log_1mp = jnp.maximum(jnp.log(1.0 - p), -100.0)
        bce = -(t * log_p + (1.0 - t) * log_1mp)
        pt = jnp.exp(-bce)
    om = 1.0 - pt
    if GAMMA == 2.0:
        mod = om * om                                # explicit square: no pow on the EUP
    else:
        mod = om ** GAMMA                            # general gamma fallback
    return mod * bce


def _focal_partial_kernel(x_ref, t_ref, o_ref, *, rows, tile_rows, needs_mask, hard):
    p = x_ref[...].astype(jnp.float32)
    t = t_ref[...].astype(jnp.float32)
    f = _modulated_bce(p, t, hard)

    if needs_mask:
        # Only the last grid block can be partial; zero its invalid rows.
        # Row-index comparison (not a global flat index) -> no int32 overflow.
        # Must remain a select: masked elements may be NaN/Inf from log() on
        # undefined data in the partial block.
        row = jax.lax.broadcasted_iota(jnp.int32, f.shape, 0)
        grow = pl.program_id(0) * tile_rows + row
        f = jnp.where(grow < rows, f, 0.0)

    # (tile_rows, 128) -> (8, 128) partial sums: pure VALU folds, no in-kernel
    # cross-lane XLU reduce.  Full lane-dense tile store (unmasked vst).
    o_ref[...] = jnp.sum(f.reshape(-1, SUBLANE, LANE), axis=0)


def focal_loss(inputs, targets, hard_targets=True):
    """Mean focal loss over all elements.  `inputs` are probabilities in (0,1).

    hard_targets=True (default) assumes targets are {0,1} and uses the
    1-transcendental fast path; pass False for soft labels to get the exact
    3-transcendental PyTorch-equivalent path.
    """
    assert inputs.shape == targets.shape
    n = int(inputs.size)

    flat_x = inputs.reshape(-1)          # bitcast for contiguous inputs; native dtype
    flat_t = targets.reshape(-1)

    bulk = n - (n % ROW_BLOCK)           # lane-aligned part handled by the kernel
    tail = n - bulk

    total = jnp.float32(0.0)

    if bulk:
        x_bulk = flat_x if bulk == n else flat_x[:bulk]
        t_bulk = flat_t if bulk == n else flat_t[:bulk]

        rows = bulk // LANE              # multiple of 8
        tile_rows = min(MAX_TILE_ROWS, rows)
        num_blocks = _cdiv(rows, tile_rows)
        needs_mask = (rows % tile_rows) != 0

        x2 = x_bulk.reshape(rows, LANE)
        t2 = t_bulk.reshape(rows, LANE)

        kernel = functools.partial(
            _focal_partial_kernel,
            rows=rows, tile_rows=tile_rows,
            needs_mask=needs_mask, hard=hard_targets)

        in_bytes = bulk * (inputs.dtype.itemsize + targets.dtype.itemsize)
        out_bytes = num_blocks * SUBLANE * LANE * 4
        cost = pl.CostEstimate(
            flops=12 * bulk,
            transcendentals=(1 if hard_targets else 3) * bulk,
            bytes_accessed=in_bytes + out_bytes)

        partials = pl.pallas_call(
            kernel,
            out_shape=jax.ShapeDtypeStruct((num_blocks * SUBLANE, LANE), jnp.float32),
            grid=(num_blocks,),
            in_specs=[
                pl.BlockSpec((tile_rows, LANE), lambda i: (i, 0)),
                pl.BlockSpec((tile_rows, LANE), lambda i: (i, 0)),
            ],
            out_specs=pl.BlockSpec((SUBLANE, LANE), lambda i: (i, 0)),
            compiler_params=pltpu.CompilerParams(
                dimension_semantics=("parallel",)),
            cost_estimate=cost,
        )(x2, t2)

        total = total + jnp.sum(partials)

    if tail:
        # <1024-element tail: plain jnp, no pad/concat, no extra HBM pass over
        # the bulk.
        p_tail = flat_x[bulk:].astype(jnp.float32)
        t_tail = flat_t[bulk:].astype(jnp.float32)
        total = total + jnp.sum(_modulated_bce(p_tail, t_tail, hard_targets))

    # alpha and the 'mean' reduction are applied once, on the scalar.
    return (ALPHA * total) / jnp.float32(n)


def focal_loss_ref(inputs, targets):
    p = inputs.astype(jnp.float32)
    t = targets.astype(jnp.float32)
    bce = -(t * jnp.maximum(jnp.log(p), -100.0)
            + (1.0 - t) * jnp.maximum(jnp.log(1.0 - p), -100.0))
    pt = jnp.exp(-bce)
    return jnp.mean(ALPHA * (1.0 - pt) ** GAMMA * bce)


if __name__ == "__main__":
    key = jax.random.PRNGKey(0)
    k1, k2, k3, k4, k5 = jax.random.split(key, 5)

    # NCHW probabilities (e.g. post-sigmoid), like the PyTorch module expects.
    shape = (2, 4, 16, 16)   # 2048 elements -> fully lane-aligned kernel path
    inputs = jax.random.uniform(k1, shape, jnp.float32, minval=1e-4, maxval=1.0 - 1e-4)
    targets = (jax.random.uniform(k2, shape, jnp.float32) > 0.5).astype(jnp.float32)

    out = jax.block_until_ready(focal_loss(inputs, targets))            # fast 1-log path
    ref = jax.block_until_ready(focal_loss_ref(inputs, targets))
    assert jnp.allclose(out, ref, rtol=1e-5, atol=1e-7), (out, ref)

    out_exact = jax.block_until_ready(focal_loss(inputs, targets, hard_targets=False))
    assert jnp.allclose(out_exact, ref, rtol=1e-5, atol=1e-7), (out_exact, ref)

    # Ragged (non-1024-multiple) size: kernel bulk + plain-jnp tail, no concat/pad.
    shape2 = (2, 3, 17, 13)  # 1326 elements -> 1024 via kernel + 302-element tail
    inputs2 = jax.random.uniform(k3, shape2, jnp.float32, minval=1e-4, maxval=1.0 - 1e-4)
    targets2 = (jax.random.uniform(k4, shape2, jnp.float32) > 0.5).astype(jnp.float32)
    out2 = jax.block_until_ready(focal_loss(inputs2, targets2))
    ref2 = jax.block_until_ready(focal_loss_ref(inputs2, targets2))
    assert jnp.allclose(out2, ref2, rtol=1e-5, atol=1e-7), (out2, ref2)

    # Soft labels -> exact (3-transcendental) path.
    soft_t = jax.random.uniform(k5, shape, jnp.float32)
    out3 = jax.block_until_ready(focal_loss(inputs, soft_t, hard_targets=False))
    ref3 = jax.block_until_ready(focal_loss_ref(inputs, soft_t))
    assert jnp.allclose(out3, ref3, rtol=1e-5, atol=1e-7), (out3, ref3)

    print("KERNEL_OK")
</pallas_src>

<mosaic_0001>
module attributes {stable_mosaic.version = 11 : i64} {
  func.func @_focal_partial_kernel(%arg0: i32, %arg1: memref<16x128xf32, #tpu.memory_space<vmem>>, %arg2: memref<16x128xf32, #tpu.memory_space<vmem>>, %arg3: memref<8x128xf32, #tpu.memory_space<vmem>>) attributes {dimension_semantics = [#tpu.dimension_semantics<parallel>], iteration_bounds = array<i64: 1>, scalar_prefetch = 0 : i64, scratch_operands = 0 : i64, tpu.core_type = #tpu.core_type<tc>, window_params = [{transform_indices = @transform_0, window_bounds = array<i64: 16, 128>}, {transform_indices = @transform_1, window_bounds = array<i64: 16, 128>}, {transform_indices = @transform_2, window_bounds = array<i64: 8, 128>}]} {
    %c0 = arith.constant 0 : index
    %c0_0 = arith.constant 0 : index
    %0 = vector.load %arg1[%c0, %c0_0] : memref<16x128xf32, #tpu.memory_space<vmem>>, vector<16x128xf32>
    %c0_1 = arith.constant 0 : index
    %c0_2 = arith.constant 0 : index
    %1 = vector.load %arg2[%c0_1, %c0_2] : memref<16x128xf32, #tpu.memory_space<vmem>>, vector<16x128xf32>
    %2 = arith.mulf %1, %0 : vector<16x128xf32>
    %cst = arith.constant 1.000000e+00 : f32
    %3 = vector.broadcast %cst : f32 to vector<16x128xf32>
    %4 = arith.subf %3, %1 : vector<16x128xf32>
    %cst_3 = arith.constant 1.000000e+00 : f32
    %5 = vector.broadcast %cst_3 : f32 to vector<16x128xf32>
    %6 = arith.subf %5, %0 : vector<16x128xf32>
    %7 = arith.mulf %4, %6 : vector<16x128xf32>
    %8 = arith.addf %2, %7 : vector<16x128xf32>
    %9 = math.log %8 : vector<16x128xf32>
    %cst_4 = arith.constant -1.000000e+02 : f32
    %10 = vector.broadcast %cst_4 : f32 to vector<16x128xf32>
    %11 = arith.maximumf %9, %10 : vector<16x128xf32>
    %cst_5 = arith.constant 0.000000e+00 : f32
    %12 = vector.broadcast %cst_5 : f32 to vector<16x128xf32>
    %13 = arith.subf %12, %11 : vector<16x128xf32>
    %cst_6 = arith.constant 1.000000e+00 : f32
    %14 = vector.broadcast %cst_6 : f32 to vector<16x128xf32>
    %15 = arith.subf %14, %8 : vector<16x128xf32>
    %16 = arith.mulf %15, %15 : vector<16x128xf32>
    %17 = arith.mulf %16, %13 : vector<16x128xf32>
    %18 = vector.shape_cast %17 : vector<16x128xf32> to vector<2x8x128xf32>
    %cst_7 = arith.constant dense<0.000000e+00> : vector<8x128xf32>
    %19 = vector.multi_reduction <add>, %18, %cst_7 [0] : vector<2x8x128xf32> to vector<8x128xf32>
    %c0_8 = arith.constant 0 : index
    %c0_9 = arith.constant 0 : index
    %20 = vector.load %arg3[%c0_8, %c0_9] : memref<8x128xf32, #tpu.memory_space<vmem>>, vector<8x128xf32>
    tpu.vector_store %arg3[%c0_8, %c0_9], %19 {strides = array<i32>} : memref<8x128xf32, #tpu.memory_space<vmem>>, vector<8x128xf32>,
    return
  }
  func.func @transform_0(%arg0: i32) -> (i32, i32) {
    %c0_i32 = arith.constant 0 : i32
    %c0_i32_0 = arith.constant 0 : i32
    return %arg0, %c0_i32 : i32, i32
  }
  func.func @transform_1(%arg0: i32) -> (i32, i32) {
    %c0_i32 = arith.constant 0 : i32
    %c0_i32_0 = arith.constant 0 : i32
    return %arg0, %c0_i32 : i32, i32
  }
  func.func @transform_2(%arg0: i32) -> (i32, i32) {
    %c0_i32 = arith.constant 0 : i32
    %c0_i32_0 = arith.constant 0 : i32
    return %arg0, %c0_i32 : i32, i32
  }
}

</mosaic_0001>

<bundles_post_ra>
// kernel: tpu_custom_call.1
= control target key start
LH: loop header
LB: loop body
LE: loop exit
PB: predicated region body
PF: predicated region fallthrough
CT: control target
= control target key end

     0   :  { %7 = vsyncpa [#allocation3], 0  ;;  %s223_s0 = inlined_call_operand.hbm [shape: f32[16,128], index: 0, kind: input, shape index: {}]   ;;  %s224_s1 = inlined_call_operand.hbm [shape: f32[16,128], index: 1, kind: input, shape index: {}]   ;;  %s225_s2 = inlined_call_operand.hbm [shape: f32[8,128], index: 2, kind: output, shape index: {}]  }
   0x1   :  { %8 = vsyncpa [#allocation6], 0 }
   0x2   :  { %9 = vsyncpa [#allocation4], 0  ;;  %s167_s9 = smov [#allocation2]   ;;  %s95_s13 = scalar_lea.hbm %s223_s0, 256 }
   0x3   :  { %s15_s10 = sshll.u32 %s167_s9, 4  ;;  %p96_p0 = scmp.ne.s32.totalorder %s223_s0, %s95_s13  ;;  %s16_s10 = int_to_ptr.vmem [resolvable:$true] %s15_s10 }
   0x4   :  { %p99_p1 = scmp.lt.u32.totalorder %s95_s13, %s223_s0 }
   0x6   :  { %p101_p2 = pnand %p99_p1, %p96_p0 }
   0x8   :  { %104 = shalt.err (!%p101_p2)
}
   0x9   :  { %s105_s18 = scalar_lea.vmem %s16_s10, 256  ;;  %p110_p4 = scmp.lt.s32.totalorder %s16_s10, %s16_s10 }
   0xa   :  { %p106_p3 = scmp.ne.s32.totalorder %s16_s10, %s105_s18  ;;  %p111_p5 = scmp.lt.s32.totalorder %s105_s18, %s105_s18 }
   0xc   :  { %p112_p6 = por %p111_p5, %p110_p4 }
   0xe   :  { %p113_p7 = pnand %p112_p6, %p106_p3 }
  0x10   :  { %116 = shalt.err (!%p113_p7)
}
  0x11   :  { %s168_s19 = smov 128   ;;  %s169_s20 = smov 8  }
  0x12   :  { %21 = dma.hbm_to_vmem [thread:$0]  %s223_s0, 256, %s16_s10, [#allocation3], %s168_s19, %s168_s19, %s169_s20  }
  0x13   :  { %s170_s23 = smov [#allocation5]   ;;  %s117_s27 = scalar_lea.hbm %s224_s1, 256 }
  0x14   :  { %s27_s24 = sshll.u32 %s170_s23, 4  ;;  %p118_p8 = scmp.ne.s32.totalorder %s224_s1, %s117_s27  ;;  %s28_s24 = int_to_ptr.vmem [resolvable:$true] %s27_s24 }
  0x15   :  { %p121_p9 = scmp.lt.u32.totalorder %s117_s27, %s224_s1 }
  0x17   :  { %p123_p10 = pnand %p121_p9, %p118_p8 }
  0x19   :  { %126 = shalt.err (!%p123_p10)
}
  0x1a   :  { %s127_s4 = scalar_lea.vmem %s28_s24, 256  ;;  %p132_p12 = scmp.lt.s32.totalorder %s28_s24, %s28_s24 }
  0x1b   :  { %p128_p11 = scmp.ne.s32.totalorder %s28_s24, %s127_s4  ;;  %p133_p13 = scmp.lt.s32.totalorder %s127_s4, %s127_s4 }
  0x1d   :  { %p134_p0 = por %p133_p13, %p132_p12 }
  0x1f   :  { %p135_p1 = pnand %p134_p0, %p128_p11 }
  0x21   :  { %138 = shalt.err (!%p135_p1)
}
  0x22   :  { %33 = dma.hbm_to_vmem [thread:$0]  %s224_s1, 256, %s28_s24, [#allocation6], %s168_s19, %s168_s19, %s169_s20  }
  0x23   :  { %161 = dma.done.wait [#allocation3], 256  }
  0x24   :  { %162 = vsyncadd [#allocation3], 4294967040 }
  0x25   :  { %163 = dma.done.wait [#allocation6], 256  }
  0x26   :  { %164 = vsyncadd [#allocation6], 4294967040  ;;  %v40_v0 = vld [vmem:[#allocation2] sm:$0xff]  ;;  %v41_v1 = vld [vmem:[#allocation2 + $0x8] sm:$0xff]  ;;  %s171_s1 = smov [#allocation7]  }
  0x27   :  { %v42_v2 = vld [vmem:[#allocation5] sm:$0xff]  ;;  %v43_v3 = vld [vmem:[#allocation5 + $0x8] sm:$0xff]  ;;  %v48_v6 = vsub.f32 1.0, %v40_v0  ;;  %v49_v7 = vsub.f32 1.0, %v41_v1  ;;  %s76_s6 = sshll.u32 %s171_s1, 4  ;;  %s77_s6 = int_to_ptr.vmem [resolvable:$true] %s76_s6 }
  0x28   :  { %v44_v4 = vmul.f32 %v42_v2, %v40_v0  ;;  %v46_v5 = vsub.f32 1.0, %v42_v2  ;;  %v45_v8 = vmul.f32 %v43_v3, %v41_v1  ;;  %v47_v9 = vsub.f32 1.0, %v43_v3  ;;  %s139_s7 = scalar_lea.vmem %s77_s6, 128  ;;  %p144_p3 = scmp.lt.s32.totalorder %s77_s6, %s77_s6 }
  0x29   :  { %p140_p2 = scmp.ne.s32.totalorder %s77_s6, %s139_s7  ;;  %p145_p4 = scmp.lt.s32.totalorder %s139_s7, %s139_s7 }
  0x2a   :  { %v50_v10 = vmul.f32 %v48_v6, %v46_v5  ;;  %v51_v11 = vmul.f32 %v49_v7, %v47_v9 }
  0x2b   :  { %p146_p5 = por %p145_p4, %p144_p3 }
  0x2c   :  { %v52_v12 = vadd.f32 %v50_v10, %v44_v4  ;;  %v53_v13 = vadd.f32 %v51_v11, %v45_v8 }
  0x2d   :  { %p147_p6 = pnand %p146_p5, %p140_p2 }
  0x2e   :  { %91 = vlog2.f32 %v52_v12  ;;  %v62_v14 = vsub.f32 1.0, %v52_v12  ;;  %v63_v16 = vsub.f32 1.0, %v53_v13 }
  0x2f   :  { %93 = vlog2.f32 %v53_v13 }
  0x30   :  { %v64_v21 = vmul.f32 %v62_v14, %v62_v14  ;;  %v65_v23 = vmul.f32 %v63_v16, %v63_v16 }
  0x38   :  { %v92_v15 = vpop.eup %91 }
  0x39   :  { %v94_v17 = vpop.eup %93  ;;  %v55_v18 = vmul.f32 0.6931472, %v92_v15 }
  0x3a   :  { %v57_v19 = vmul.f32 0.6931472, %v94_v17 }
  0x3b   :  { %v58_v20 = vmax.f32 %v55_v18, -100.0 }
  0x3c   :  { %v59_v22 = vmax.f32 %v57_v19, -100.0 }
  0x3d   :  { %v60_v24 = vsub.f32 0.0, %v58_v20 }
  0x3e   :  { %v61_v25 = vsub.f32 0.0, %v59_v22 }
  0x3f   :  { %v66_v26 = vmul.f32 %v64_v21, %v60_v24 }
  0x40   :  { %v67_v27 = vmul.f32 %v65_v23, %v61_v25 }
  0x42   :  { %v68_v28 = vadd.f32 %v67_v27, %v66_v26 }
  0x44   :  { %69 = vst [vmem:[#allocation7] sm:$0xff] %v68_v28 }
  0x45   :  { %150 = shalt.err (!%p147_p6)
}
  0x46   :  { %s151_s10 = scalar_lea.hbm %s225_s2, 128 }
  0x47   :  { %p152_p7 = scmp.ne.s32.totalorder %s225_s2, %s151_s10  ;;  %p155_p8 = scmp.lt.u32.totalorder %s151_s10, %s225_s2 }
  0x49   :  { %p157_p9 = pnand %p155_p8, %p152_p7 }
  0x4b   :  { %160 = shalt.err (!%p157_p9)
}
  0x4c   :  { %79 = dma.vmem_to_hbm [thread:$0]  %s77_s6, 128, %s225_s2, [#allocation4]  }
  0x4d   :  { %165 = dma.done.wait [#allocation4], 128  }
  0x4e   :  { %166 = vsyncadd [#allocation4], 4294967168 }
  0x4f   :  { %83 = vsyncpa [#allocation3], 1 }
  0x50   :  { %84 = vsyncpa [#allocation6], 1 }
  0x51   :  { %85 = vsyncpa [#allocation4], 1 }

</bundles_post_ra>
